<compile_context>
chip_gen: v7x
topology: tpu7x:2x2x1
jax: 0.10.0
libtpu: 0.0.40
codegen_flags: <defaults>
</compile_context>

<pallas_src>
import math
import functools

import jax
import jax.numpy as jnp
from jax.experimental import pallas as pl
from jax.experimental.pallas import tpu as pltpu


def _round_up(x, m):
    return (x + m - 1) // m * m


# --------------------------------------------------------------------------- #
# Kernel
# --------------------------------------------------------------------------- #
def _ffn_kernel(x_ref, w1_ref, b1_ref, w2_ref, b2_ref, o_ref, acc_ref, *,
                compute_dtype):
    # x_ref:  (tm, d_model)   w1_ref: (d_model, tf)   b1_ref: (1, tf)  fp32
    # w2_ref: (tf, d_model)   b2_ref: (1, d_model)    fp32
    # o_ref:  (tm, d_model)   acc_ref: (tm, d_model)  fp32 scratch
    j = pl.program_id(1)

    x = x_ref[...]
    if compute_dtype is not None and x.dtype != compute_dtype:
        x = x.astype(compute_dtype)          # in-kernel cast: x stays fp32 in HBM

    # First matmul on the MXU; fp32 accumulation, fp32 bias + ReLU.
    h = jnp.dot(x, w1_ref[...], preferred_element_type=jnp.float32)
    h = jnp.maximum(h + b1_ref[...], 0.0)

    # Partial contribution of this d_ff slab to the second matmul.
    p = jnp.dot(h.astype(w2_ref.dtype), w2_ref[...],
                preferred_element_type=jnp.float32)

    @pl.when(j == 0)
    def _init():
        # Write the first partial directly and fold b2 in: no zero+reload,
        # no finalize add.
        acc_ref[...] = p + b2_ref[...]

    @pl.when(j > 0)
    def _accumulate():
        acc_ref[...] += p

    @pl.when(j == pl.num_programs(1) - 1)
    def _finalize():
        o_ref[...] = acc_ref[...].astype(o_ref.dtype)


# --------------------------------------------------------------------------- #
# Tile planning
# --------------------------------------------------------------------------- #
@functools.lru_cache(maxsize=None)
def _vmem_budget_bytes():
    """3/4 of physical VMEM: ~48 MiB on v7x (64 MiB), ~96 MiB on v5e/v6e (128 MiB)."""
    cap = 64 * 1024 * 1024
    try:
        cap = int(pltpu.get_tpu_info().vmem_capacity_bytes)
    except Exception:
        pass
    return (cap * 3) // 4


def _vmem_plan_bytes(tm, tf, d_model, x_item, w_item, out_item):
    cast_x = w_item if w_item != x_item else 0
    return (2 * tm * d_model * (x_item + out_item)      # x / out tiles (double buffered)
            + 2 * 2 * tf * d_model * w_item             # W1 + W2 slabs (double buffered)
            + 2 * (tf + d_model) * 4                    # b1 / b2 (fp32, double buffered)
            + tm * d_model * 4                          # fp32 accumulator scratch
            + tm * tf * (4 + w_item)                    # h (fp32) + cast copy for 2nd matmul
            + tm * d_model * cast_x)                    # in-kernel x cast copy


def _candidate_row_tiles(rows, tm_req):
    rows_pad = max(8, _round_up(rows, 8))
    if tm_req is not None:
        return [max(8, _round_up(min(tm_req, rows_pad), 8))]
    cands = [t for t in (1024, 512, 256, 128) if t <= rows_pad]
    if not cands:
        cands = [rows_pad]                   # tiny inputs: one full-extent tile
    return cands                             # descending


def _candidate_ff_tiles(d_ff, tf_req):
    if tf_req is not None:
        return [tf_req]
    cands = [d_ff]                           # resident weights (single j step) first
    if d_ff % 128 == 0:
        for t in (4096, 2048, 1024, 512, 256, 128):
            if t < d_ff and d_ff % t == 0:
                cands.append(t)              # streamed slabs, large K preferred
    return cands


def _plan_tiles(rows, d_model, d_ff, x_item, w_item, out_item, budget,
                tm_req, tf_req):
    tms = _candidate_row_tiles(rows, tm_req)
    tfs = _candidate_ff_tiles(d_ff, tf_req)
    for tf in tfs:                           # prefer resident weights
        for tm in tms:                       # then the largest row tile that fits
            need = _vmem_plan_bytes(tm, tf, d_model, x_item, w_item, out_item)
            if need <= budget:
                return tm, tf, need
    tm, tf = tms[-1], tfs[-1]                # nothing fits cleanly: smallest plan
    return tm, tf, _vmem_plan_bytes(tm, tf, d_model, x_item, w_item, out_item)


# --------------------------------------------------------------------------- #
# Public entry point
# --------------------------------------------------------------------------- #
@functools.partial(jax.jit, static_argnames=("tm", "tf", "compute_dtype"))
def feed_forward_unit(x, w1, b1, w2, b2, *, tm=None, tf=None,
                      compute_dtype=jnp.bfloat16):
    """relu(x @ W1 + b1) @ W2 + b2 with x: [batch, seq, d_model]."""
    batch, seq, d_model = x.shape
    d_ff = w1.shape[1]
    out_dtype = x.dtype
    rows = batch * seq

    # Weights go to the MXU compute dtype at rest (reused across all row tiles,
    # possibly VMEM-resident).  x is cast in-kernel.  Biases / accum stay fp32.
    if compute_dtype is not None:
        w1 = w1.astype(compute_dtype)
        w2 = w2.astype(compute_dtype)
    b1 = b1.reshape(1, d_ff).astype(jnp.float32)
    b2 = b2.reshape(1, d_model).astype(jnp.float32)

    x2 = x.reshape(rows, d_model)            # no HBM copy
    x_item = jnp.dtype(x2.dtype).itemsize
    w_item = jnp.dtype(w1.dtype).itemsize
    out_item = jnp.dtype(out_dtype).itemsize

    budget = _vmem_budget_bytes()
    tm_, tf_, need = _plan_tiles(rows, d_model, d_ff, x_item, w_item, out_item,
                                 budget, tm, tf)

    assert tm_ % 8 == 0, "row tile must be a multiple of 8 (sublane constraint)"
    assert d_ff % tf_ == 0, "d_ff tile must divide d_ff"
    assert tf_ == d_ff or tf_ % 128 == 0, "d_ff tile must be lane aligned"

    n_ff_tiles = d_ff // tf_
    grid = (pl.cdiv(rows, tm_), n_ff_tiles)  # reduction axis LAST
    n_row_tiles = grid[0]

    # Headroom for compiler internal scratch, clamped to the per-gen budget.
    vmem_limit = int(min(budget, max(need + (8 << 20), 32 << 20)))

    # With a single j step the weight block index is grid-invariant -> weights
    # are fetched from HBM once; otherwise they re-stream once per row tile.
    weight_reads = 1 if n_ff_tiles == 1 else n_row_tiles
    cost = pl.CostEstimate(
        flops=4 * rows * d_model * d_ff,
        transcendentals=0,
        bytes_accessed=(rows * d_model * (x_item + out_item)
                        + weight_reads * (w1.size + w2.size) * w_item
                        + (d_ff + d_model) * 4),
    )

    out = pl.pallas_call(
        functools.partial(_ffn_kernel, compute_dtype=compute_dtype),
        out_shape=jax.ShapeDtypeStruct((rows, d_model), out_dtype),
        grid_spec=pltpu.PrefetchScalarGridSpec(
            num_scalar_prefetch=0,
            grid=grid,
            in_specs=[
                pl.BlockSpec((tm_, d_model), lambda i, j: (i, 0)),   # x row tile
                pl.BlockSpec((d_model, tf_), lambda i, j: (0, j)),   # W1 column slab
                pl.BlockSpec((1, tf_),       lambda i, j: (0, j)),   # b1 slab
                pl.BlockSpec((tf_, d_model), lambda i, j: (j, 0)),   # W2 row slab
                pl.BlockSpec((1, d_model),   lambda i, j: (0, 0)),   # b2
            ],
            # Same block across j => output (and acc scratch) stay resident.
            out_specs=pl.BlockSpec((tm_, d_model), lambda i, j: (i, 0)),
            scratch_shapes=[pltpu.VMEM((tm_, d_model), jnp.float32)],
        ),
        compiler_params=pltpu.CompilerParams(
            dimension_semantics=("parallel", "arbitrary"),
            vmem_limit_bytes=vmem_limit,
        ),
        cost_estimate=cost,
    )(x2, w1, b1, w2, b2)

    return out.reshape(batch, seq, d_model)


# --------------------------------------------------------------------------- #
# Parameter init (mirrors torch.nn.Linear defaults)
# --------------------------------------------------------------------------- #
def init_ffn_params(key, d_model, d_ff, dtype=jnp.float32):
    """U(-1/sqrt(fan_in), +1/sqrt(fan_in)); weights stored [in, out] so the
    kernel computes x @ W (transpose of torch's [out, in])."""
    k1, k2, k3, k4 = jax.random.split(key, 4)
    bound1 = 1.0 / math.sqrt(d_model)
    bound2 = 1.0 / math.sqrt(d_ff)
    w1 = jax.random.uniform(k1, (d_model, d_ff), dtype, -bound1, bound1)
    b1 = jax.random.uniform(k2, (1, d_ff), dtype, -bound1, bound1)
    w2 = jax.random.uniform(k3, (d_ff, d_model), dtype, -bound2, bound2)
    b2 = jax.random.uniform(k4, (1, d_model), dtype, -bound2, bound2)
    return w1, b1, w2, b2


if __name__ == "__main__":
    key = jax.random.PRNGKey(0)

    # Case 1: tiny shapes from the module spec, fp32 compute path, tight check.
    batch, seq, d_model, d_ff = 2, 8, 32, 64
    kx, kp, key = jax.random.split(key, 3)
    x = jax.random.normal(kx, (batch, seq, d_model), jnp.float32)
    w1, b1, w2, b2 = init_ffn_params(kp, d_model, d_ff)
    ref = jnp.maximum(x @ w1 + b1[0], 0.0) @ w2 + b2[0]

    y32 = jax.block_until_ready(
        feed_forward_unit(x, w1, b1, w2, b2, compute_dtype=jnp.float32))
    assert y32.shape == (batch, seq, d_model)
    assert jnp.allclose(y32, ref, atol=1e-5, rtol=1e-5)

    # Default bf16 path on the same tiny case (loose tolerance).
    ybf = jax.block_until_ready(feed_forward_unit(x, w1, b1, w2, b2))
    assert jnp.allclose(ybf, ref, atol=5e-2, rtol=5e-2)

    # Case 2: exercises resident-weight auto-planning (tf == d_ff, single j
    # step), a partial (masked) row tile, and then an explicitly streamed
    # configuration (tm=64, tf=128 -> 4 row tiles, 2 accumulation steps).
    batch, seq, d_model, d_ff = 3, 70, 128, 256
    kx, kp = jax.random.split(key)
    x = jax.random.normal(kx, (batch, seq, d_model), jnp.float32)
    w1, b1, w2, b2 = init_ffn_params(kp, d_model, d_ff)
    ref = jnp.maximum(x @ w1 + b1[0], 0.0) @ w2 + b2[0]

    y_auto = jax.block_until_ready(feed_forward_unit(x, w1, b1, w2, b2))
    assert jnp.allclose(y_auto, ref, atol=5e-2, rtol=5e-2)

    y_stream32 = jax.block_until_ready(
        feed_forward_unit(x, w1, b1, w2, b2, tm=64, tf=128,
                          compute_dtype=jnp.float32))
    assert jnp.allclose(y_stream32, ref, atol=1e-4, rtol=1e-4)

    y_streambf = jax.block_until_ready(
        feed_forward_unit(x, w1, b1, w2, b2, tm=64, tf=128))
    assert jnp.allclose(y_streambf, ref, atol=5e-2, rtol=5e-2)

    print("KERNEL_OK")
</pallas_src>

<mosaic_0001>
module attributes {stable_mosaic.version = 11 : i64} {
  func.func @_ffn_kernel(%arg0: i32, %arg1: i32, %arg2: memref<16x32xf32, #tpu.memory_space<vmem>>, %arg3: memref<32x64xf32, #tpu.memory_space<vmem>>, %arg4: memref<1x64xf32, #tpu.memory_space<vmem>>, %arg5: memref<64x32xf32, #tpu.memory_space<vmem>>, %arg6: memref<1x32xf32, #tpu.memory_space<vmem>>, %arg7: memref<16x32xf32, #tpu.memory_space<vmem>>, %arg8: memref<16x32xf32, #tpu.memory_space<vmem>>) attributes {dimension_semantics = [#tpu.dimension_semantics<parallel>, #tpu.dimension_semantics<arbitrary>], iteration_bounds = array<i64: 1, 1>, scalar_prefetch = 0 : i64, scratch_operands = 1 : i64, tpu.core_type = #tpu.core_type<tc>, window_params = [{transform_indices = @transform_0, window_bounds = array<i64: 16, 32>}, {transform_indices = @transform_1, window_bounds = array<i64: 32, 64>}, {transform_indices = @transform_2, window_bounds = array<i64: 1, 64>}, {transform_indices = @transform_3, window_bounds = array<i64: 64, 32>}, {pipeline_mode = #tpu.pipeline_mode<synchronous>, transform_indices = @transform_4, window_bounds = array<i64: 1, 32>}, {transform_indices = @transform_5, window_bounds = array<i64: 16, 32>}]} {
    %c0 = arith.constant 0 : index
    %c0_0 = arith.constant 0 : index
    %0 = vector.load %arg2[%c0, %c0_0] : memref<16x32xf32, #tpu.memory_space<vmem>>, vector<16x32xf32>
    %c0_1 = arith.constant 0 : index
    %c0_2 = arith.constant 0 : index
    %1 = vector.load %arg3[%c0_1, %c0_2] : memref<32x64xf32, #tpu.memory_space<vmem>>, vector<32x64xf32>
    %cst = arith.constant dense<0.000000e+00> : vector<16x64xf32>
    %2 = tpu.matmul %0, %1, %cst {dimension_numbers = #tpu.dot_dimension_numbers<[1], [0], [0], [1], [0, 0, 1, 1], [], []>} : vector<16x32xf32>, vector<32x64xf32>, vector<16x64xf32> -> vector<16x64xf32>
    %c0_3 = arith.constant 0 : index
    %c0_4 = arith.constant 0 : index
    %3 = vector.load %arg4[%c0_3, %c0_4] : memref<1x64xf32, #tpu.memory_space<vmem>>, vector<1x64xf32>
    %4 = vector.broadcast %3 : vector<1x64xf32> to vector<16x64xf32>
    %5 = arith.addf %2, %4 : vector<16x64xf32>
    %cst_5 = arith.constant 0.000000e+00 : f32
    %6 = vector.broadcast %cst_5 : f32 to vector<16x64xf32>
    %7 = arith.maximumf %5, %6 : vector<16x64xf32>
    %c0_6 = arith.constant 0 : index
    %c0_7 = arith.constant 0 : index
    %8 = vector.load %arg5[%c0_6, %c0_7] : memref<64x32xf32, #tpu.memory_space<vmem>>, vector<64x32xf32>
    %cst_8 = arith.constant dense<0.000000e+00> : vector<16x32xf32>
    %9 = tpu.matmul %7, %8, %cst_8 {dimension_numbers = #tpu.dot_dimension_numbers<[1], [0], [0], [1], [0, 0, 1, 1], [], []>} : vector<16x64xf32>, vector<64x32xf32>, vector<16x32xf32> -> vector<16x32xf32>
    %c0_i32 = arith.constant 0 : i32
    %10 = arith.cmpi eq, %arg1, %c0_i32 : i32
    %11 = arith.extui %10 : i1 to i32
    %c0_i32_9 = arith.constant 0 : i32
    %12 = arith.cmpi ne, %11, %c0_i32_9 : i32
    scf.if %12 {
      %c0_14 = arith.constant 0 : index
      %c0_15 = arith.constant 0 : index
      %19 = vector.load %arg6[%c0_14, %c0_15] : memref<1x32xf32, #tpu.memory_space<vmem>>, vector<1x32xf32>
      %20 = vector.broadcast %19 : vector<1x32xf32> to vector<16x32xf32>
      %21 = arith.addf %9, %20 : vector<16x32xf32>
      %c0_16 = arith.constant 0 : index
      %c0_17 = arith.constant 0 : index
      %22 = vector.load %arg8[%c0_16, %c0_17] : memref<16x32xf32, #tpu.memory_space<vmem>>, vector<16x32xf32>
      tpu.vector_store %arg8[%c0_16, %c0_17], %21 {strides = array<i32>} : memref<16x32xf32, #tpu.memory_space<vmem>>, vector<16x32xf32>,
    } else {
    }
    %c0_i32_10 = arith.constant 0 : i32
    %13 = arith.cmpi sgt, %arg1, %c0_i32_10 : i32
    %14 = arith.extui %13 : i1 to i32
    %c0_i32_11 = arith.constant 0 : i32
    %15 = arith.cmpi ne, %14, %c0_i32_11 : i32
    scf.if %15 {
      %c0_14 = arith.constant 0 : index
      %c0_15 = arith.constant 0 : index
      %19 = vector.load %arg8[%c0_14, %c0_15] : memref<16x32xf32, #tpu.memory_space<vmem>>, vector<16x32xf32>
      %20 = arith.addf %19, %9 : vector<16x32xf32>
      %c0_16 = arith.constant 0 : index
      %c0_17 = arith.constant 0 : index
      %21 = vector.load %arg8[%c0_16, %c0_17] : memref<16x32xf32, #tpu.memory_space<vmem>>, vector<16x32xf32>
      tpu.vector_store %arg8[%c0_16, %c0_17], %20 {strides = array<i32>} : memref<16x32xf32, #tpu.memory_space<vmem>>, vector<16x32xf32>,
    } else {
    }
    %c0_i32_12 = arith.constant 0 : i32
    %16 = arith.cmpi eq, %arg1, %c0_i32_12 : i32
    %17 = arith.extui %16 : i1 to i32
    %c0_i32_13 = arith.constant 0 : i32
    %18 = arith.cmpi ne, %17, %c0_i32_13 : i32
    scf.if %18 {
      %c0_14 = arith.constant 0 : index
      %c0_15 = arith.constant 0 : index
      %19 = vector.load %arg8[%c0_14, %c0_15] : memref<16x32xf32, #tpu.memory_space<vmem>>, vector<16x32xf32>
      %c0_16 = arith.constant 0 : index
      %c0_17 = arith.constant 0 : index
      %20 = vector.load %arg7[%c0_16, %c0_17] : memref<16x32xf32, #tpu.memory_space<vmem>>, vector<16x32xf32>
      tpu.vector_store %arg7[%c0_16, %c0_17], %19 {strides = array<i32>} : memref<16x32xf32, #tpu.memory_space<vmem>>, vector<16x32xf32>,
    } else {
    }
    return
  }
  func.func @transform_0(%arg0: i32, %arg1: i32) -> (i32, i32) {
    %c0_i32 = arith.constant 0 : i32
    %c0_i32_0 = arith.constant 0 : i32
    return %arg0, %c0_i32 : i32, i32
  }
  func.func @transform_1(%arg0: i32, %arg1: i32) -> (i32, i32) {
    %c0_i32 = arith.constant 0 : i32
    %c0_i32_0 = arith.constant 0 : i32
    return %c0_i32, %arg1 : i32, i32
  }
  func.func @transform_2(%arg0: i32, %arg1: i32) -> (i32, i32) {
    %c0_i32 = arith.constant 0 : i32
    %c0_i32_0 = arith.constant 0 : i32
    return %c0_i32, %arg1 : i32, i32
  }
  func.func @transform_3(%arg0: i32, %arg1: i32) -> (i32, i32) {
    %c0_i32 = arith.constant 0 : i32
    %c0_i32_0 = arith.constant 0 : i32
    return %arg1, %c0_i32 : i32, i32
  }
  func.func @transform_4(%arg0: i32, %arg1: i32) -> (i32, i32) {
    %c0_i32 = arith.constant 0 : i32
    %c0_i32_0 = arith.constant 0 : i32
    %c0_i32_1 = arith.constant 0 : i32
    return %c0_i32, %c0_i32_0 : i32, i32
  }
  func.func @transform_5(%arg0: i32, %arg1: i32) -> (i32, i32) {
    %c0_i32 = arith.constant 0 : i32
    %c0_i32_0 = arith.constant 0 : i32
    return %arg0, %c0_i32 : i32, i32
  }
}

</mosaic_0001>

<bundles_post_ra>
// kernel: feed_forward_unit.1
= control target key start
LH: loop header
LB: loop body
LE: loop exit
PB: predicated region body
PF: predicated region fallthrough
CT: control target
= control target key end

     0   :  { %vm34_vm0 = vcmask 261120   ;;  %s458_s0 = inlined_call_operand.vmem [shape: f32[16,32], index: 0, kind: input, shape index: {}]   ;;  %s459_s1 = inlined_call_operand.vmem [shape: f32[32,64], index: 1, kind: input, shape index: {}]   ;;  %s460_s2 = inlined_call_operand.vmem [shape: f32[1,64], index: 2, kind: input, shape index: {}]   ;;  %s461_s3 = inlined_call_operand.vmem [shape: f32[64,32], index: 3, kind: input, shape index: {}]   ;;  %s462_s4 = inlined_call_operand.vmem [shape: f32[1,32], index: 4, kind: input, shape index: {}]   ;;  %s463_s5 = inlined_call_operand.hbm [shape: f32[16,32], index: 5, kind: output, shape index: {}]  }
   0x1   :  { %v23_v0 = vld [vmem:[%s459_s1] sm:$0xff]  ;;  %v24_v1 = vld [vmem:[%s459_s1 + $0x8] sm:$0xff]  ;;  %v25_v2 = vld [vmem:[%s459_s1 + $0x10] sm:$0xff] }
   0x2   :  { %v308_v3 = vpack.c.bf16 %v24_v1, %v23_v0  ;;  %v26_v4 = vld [vmem:[%s459_s1 + $0x18] sm:$0xff]  ;;  %v21_v5 = vld [vmem:[%s458_s0] sm:$0xff]  ;;  %v119_v8 = vld [vmem:[%s461_s3 + $0x8] sm:$0xff] }
   0x3   :  { %v312_v6 = vpack.c.bf16 %v26_v4, %v25_v2  ;;  %286 = vmatprep.mubr.msk.f32.mxu0 %vm34_vm0, %v21_v5  ;;  %v118_v7 = vld [vmem:[%s461_s3] sm:$0xff]  ;;  %v120_v9 = vld [vmem:[%s461_s3 + $0x10] sm:$0xff]  ;;  %v121_v11 = vld [vmem:[%s461_s3 + $0x18] sm:$0xff] }
   0x4   :  { %309 = vmatprep.subr.bf16.mxu0 %v308_v3  ;;  %v316_v10 = vpack.c.bf16 %v119_v8, %v118_v7  ;;  %v320_v12 = vpack.c.bf16 %v121_v11, %v120_v9  ;;  %v122_v13 = vld [vmem:[%s461_s3 + $0x20] sm:$0xff]  ;;  %v123_v14 = vld [vmem:[%s461_s3 + $0x28] sm:$0xff] }
   0x5   :  { %311 = vmatpush3.bf16.msra.mxu0 %v308_v3 }
   0x6   :  { %10 = vsyncpa [#allocation4], 0  ;;  %313 = vmatprep.subr.bf16.mxu0 %v312_v6  ;;  %317 = vmatprep.subr.bf16.mxu1 %v316_v10  ;;  %v324_v15 = vpack.c.bf16 %v123_v14, %v122_v13  ;;  %v22_v16 = vld [vmem:[%s458_s0 + $0x8] sm:$0xff]  ;;  %v124_v17 = vld [vmem:[%s461_s3 + $0x30] sm:$0xff]  ;;  %vm126_vm1 = vcmask 523264  }
   0x7   :  { %319 = vmatpush3.bf16.msra.mxu1 %v316_v10  ;;  %v125_v18 = vld [vmem:[%s461_s3 + $0x38] sm:$0xff]  ;;  %v256_v20 = vld [vmem:[%s460_s2] ss:$0 sm:$0xff]  ;;  %s359_s2 = smov [#allocation3]  }
   0x8   :  { %321 = vmatprep.subr.bf16.mxu1 %v320_v12  ;;  %v328_v19 = vpack.c.bf16 %v125_v18, %v124_v17  ;;  %v261_v27 = vld [vmem:[%s462_s4] ss:$0 sm:$0xff]  ;;  %s245_s3 = sshll.u32 %s359_s2, 4  ;;  %s246_s3 = int_to_ptr.vmem [resolvable:$true] %s245_s3 }
   0x9   :  { %315 = vmatpush3.bf16.msra.mxu0 %v312_v6  ;;  %s335_s23 = scalar_lea.vmem %s246_s3, 256  ;;  %p340_p1 = scmp.lt.s32.totalorder %s246_s3, %s246_s3 }
   0xa   :  { %p336_p0 = scmp.ne.s32.totalorder %s246_s3, %s335_s23  ;;  %p341_p2 = scmp.lt.s32.totalorder %s335_s23, %s335_s23 }
   0xb   :  { %323 = vmatpush3.bf16.msra.mxu1 %v320_v12 }
   0xc   :  { %287 = vmatmul.mubr.msk.f32.vlgmr.msra.gmra.mrb[0].mxu0 %vm34_vm0, %v22_v16  ;;  %325 = vmatprep.subr.bf16.mxu1 %v324_v15  ;;  %p342_p3 = por %p341_p2, %p340_p1 }
   0xe   :  { %p343_p4 = pnand %p342_p3, %p336_p0 }
   0xf   :  { %327 = vmatpush3.bf16.msra.mxu1 %v324_v15 }
  0x10   :  { %329 = vmatprep.subr.bf16.mxu1 %v328_v19 }
  0x13   :  { %331 = vmatpush3.bf16.msra.mxu1 %v328_v19 }
  0xdf   :  { %v288_v21 = vpop.f32.mrb[0].mxu0 }
  0xe0   :  { %v113_v22 = vadd.f32 %v288_v21, %v256_v20  ;;  %v107_v23 = vpop.f32.mrb[1].mxu0 }
  0xe1   :  { %v108_v24 = vadd.f32 %v256_v20, %v107_v23 }
  0xe2   :  { %v117_v26 = vmax.f32 %v113_v22, 0.0 }
  0xe3   :  { %v116_v25 = vmax.f32 %v108_v24, 0.0 }
  0xe5   :  { %305 = vmatprep.mubr.msk.f32.mxu1 %vm126_vm1, %v116_v25 }
  0xe6   :  { %306 = vmatmul.mubr.msk.f32.vlgmr.msra.gmra.mrb[0].mxu1 %vm126_vm1, %v117_v26 }
 0x1b9   :  { %v307_v28 = vpop.f32.mrb[0].mxu1 }
 0x1ba   :  { %v220_v29 = vadd.f32 %v307_v28, %v261_v27  ;;  %v199_v30 = vpop.f32.mrb[1].mxu1 }
 0x1bb   :  { %v219_v31 = vadd.f32 %v261_v27, %v199_v30 }
 0x1bc   :  { %222 = vst.msk [vmem:[#allocation2 + $0x8] sm:$0xff] %vm34_vm0, %v220_v29 }
 0x1bd   :  { %221 = vst.msk [vmem:[#allocation2] sm:$0xff] %vm34_vm0, %v219_v31 }
 0x1c3   :  { %v237_v32 = vld [vmem:[#allocation2 + $0x8] sm:$0xff] }
 0x1c4   :  { %v236_v33 = vld [vmem:[#allocation2] sm:$0xff]  ;;  %239 = vst.msk [vmem:[#allocation3 + $0x8] sm:$0xff] %vm34_vm0, %v237_v32 }
 0x1c5   :  { %238 = vst.msk [vmem:[#allocation3] sm:$0xff] %vm34_vm0, %v236_v33 }
 0x1c6   :  { %346 = shalt.err (!%p343_p4)
}
 0x1c7   :  { %s347_s25 = scalar_lea.hbm %s463_s5, 256 }
 0x1c8   :  { %p348_p5 = scmp.ne.s32.totalorder %s463_s5, %s347_s25  ;;  %p351_p6 = scmp.lt.u32.totalorder %s347_s25, %s463_s5 }
 0x1ca   :  { %p353_p7 = pnand %p351_p6, %p348_p5 }
 0x1cc   :  { %356 = shalt.err (!%p353_p7)
}
 0x1cd   :  { %s360_s30 = smov 128   ;;  %s361_s6 = smov 8  }
 0x1ce   :  { %251 = dma.vmem_to_hbm [thread:$0]  %s246_s3, 256, %s463_s5, [#allocation4], %s360_s30, %s360_s30, %s361_s6  }
 0x1cf   :  { %357 = dma.done.wait [#allocation4], 256  }
 0x1d0   :  { %358 = vsyncadd [#allocation4], 4294967040 }
 0x1d1   :  { %255 = vsyncpa [#allocation4], 1 }

</bundles_post_ra>
